<compile_context>
chip_gen: v6e
topology: v6e:2x2x1
jax: 0.10.0
libtpu: 0.0.40
codegen_flags: <defaults>
</compile_context>

<pallas_src>
import jax
import jax.numpy as jnp
from jax.experimental import pallas as pl
from jax.experimental.pallas import tpu as pltpu


def _pooler_kernel_fused(x_ref, wt_ref, b_ref, o_ref):
    # Single-K-tile path: matmul + bias + tanh fully fused, no scratch.
    # x_ref : (tB, H)   first-token activations (native dtype)
    # wt_ref: (H,  tN)  dense weight, (in, out) layout
    # b_ref : (1,  tN)  dense bias
    # o_ref : (tB, tN)  pooled output tile
    y = jax.lax.dot_general(
        x_ref[...], wt_ref[...],
        dimension_numbers=(((1,), (0,)), ((), ())),
        preferred_element_type=jnp.float32,
    )
    y = y + b_ref[...].astype(jnp.float32)            # (tB,tN) + (1,tN)
    o_ref[...] = jnp.tanh(y).astype(o_ref.dtype)


def _pooler_kernel_ksplit(x_ref, wt_ref, b_ref, o_ref, acc_ref):
    # General path: K is tiled; f32 accumulator lives across the K axis.
    # x_ref : (tB, tK), wt_ref: (tK, tN), b_ref: (1, tN), o_ref: (tB, tN)
    # acc_ref: (tB, tN) f32 accumulator scratch
    k = pl.program_id(2)

    @pl.when(k == 0)
    def _init():
        acc_ref[...] = jnp.zeros_like(acc_ref)

    acc_ref[...] += jax.lax.dot_general(
        x_ref[...], wt_ref[...],
        dimension_numbers=(((1,), (0,)), ((), ())),
        preferred_element_type=jnp.float32,
    )

    @pl.when(k == pl.num_programs(2) - 1)
    def _finalize():
        y = acc_ref[...] + b_ref[...].astype(jnp.float32)
        o_ref[...] = jnp.tanh(y).astype(o_ref.dtype)


def _pick_tile(dim, candidates):
    """Largest candidate tile that evenly divides `dim`; else the full dim."""
    for t in candidates:
        if dim >= t and dim % t == 0:
            return t
    return dim


def roberta_pooler(hidden_states, weight_t, bias):
    """RobertaPooler forward.

    hidden_states: (B, S, H)
    weight_t:      (H, H) dense weight in (in, out) layout, i.e. W.T of the
                   PyTorch (out, in) parameter -- pre-transposed once outside
                   the hot path.
    bias:          (H,)
    returns:       (B, H) = tanh(hidden_states[:, 0] @ weight_t + bias)
    """
    B, S, H = hidden_states.shape
    assert weight_t.shape == (H, H)
    assert bias.shape == (H,)

    # Tiny B*H slice done in plain JAX; the H*H weight read dominates HBM.
    first_token = hidden_states[:, 0, :]
    bias2d = bias.reshape(1, H)

    # Lane dims: multiples of 128 (or the full dim); sublane dim small.
    tB = _pick_tile(B, (256, 128, 64, 32, 16, 8))
    tN = _pick_tile(H, (512, 384, 256, 128))
    tK = _pick_tile(H, (512, 384, 256, 128))

    dbytes = jnp.dtype(hidden_states.dtype).itemsize
    cost = pl.CostEstimate(
        flops=2 * B * H * H,
        transcendentals=B * H,
        bytes_accessed=(B * H + H * H + H + B * H) * dbytes,
    )

    if tK == H:
        # H fits in one K tile: fully fused kernel, no accumulator scratch.
        grid = (B // tB, H // tN)
        return pl.pallas_call(
            _pooler_kernel_fused,
            out_shape=jax.ShapeDtypeStruct((B, H), hidden_states.dtype),
            grid_spec=pltpu.PrefetchScalarGridSpec(
                num_scalar_prefetch=0,
                grid=grid,
                in_specs=[
                    pl.BlockSpec((tB, H), lambda i, j: (i, 0)),   # x
                    pl.BlockSpec((H, tN), lambda i, j: (0, j)),   # W (in,out)
                    pl.BlockSpec((1, tN), lambda i, j: (0, j)),   # bias
                ],
                out_specs=pl.BlockSpec((tB, tN), lambda i, j: (i, j)),
            ),
            compiler_params=pltpu.CompilerParams(
                dimension_semantics=("parallel", "parallel"),
            ),
            cost_estimate=cost,
        )(first_token, weight_t, bias2d)

    # General path: K is tiled -> reduction axis last ("arbitrary").
    grid = (B // tB, H // tN, H // tK)
    return pl.pallas_call(
        _pooler_kernel_ksplit,
        out_shape=jax.ShapeDtypeStruct((B, H), hidden_states.dtype),
        grid_spec=pltpu.PrefetchScalarGridSpec(
            num_scalar_prefetch=0,
            grid=grid,
            in_specs=[
                pl.BlockSpec((tB, tK), lambda i, j, k: (i, k)),   # x
                pl.BlockSpec((tK, tN), lambda i, j, k: (k, j)),   # W (in,out)
                pl.BlockSpec((1, tN), lambda i, j, k: (0, j)),    # bias
            ],
            out_specs=pl.BlockSpec((tB, tN), lambda i, j, k: (i, j)),
            scratch_shapes=[pltpu.VMEM((tB, tN), jnp.float32)],
        ),
        compiler_params=pltpu.CompilerParams(
            # N ("parallel") split lets the two v7x TensorCores each stream
            # only half the weight; K is the reduction -> "arbitrary", last.
            dimension_semantics=("parallel", "parallel", "arbitrary"),
        ),
        cost_estimate=cost,
    )(first_token, weight_t, bias2d)


if __name__ == "__main__":
    B, S, H = 2, 8, 32  # small shapes consistent with the module

    key = jax.random.PRNGKey(0)
    k_hs, k_w, k_b = jax.random.split(key, 3)

    dtype = jnp.bfloat16  # bf16 end-to-end: operands go to the MXU unconverted
    hidden_states = jax.random.normal(k_hs, (B, S, H), dtype=jnp.float32).astype(dtype)
    # PyTorch-style nn.Linear(hidden, hidden) parameters: weight is (out, in).
    weight = (jax.random.normal(k_w, (H, H), dtype=jnp.float32) * 0.02).astype(dtype)
    bias = (jax.random.normal(k_b, (H,), dtype=jnp.float32) * 0.02).astype(dtype)

    # One-time re-layout to (in, out); in production the parameter would be
    # stored pre-transposed so this never appears in the hot path.
    weight_t = weight.T

    out = roberta_pooler(hidden_states, weight_t, bias)
    out = jax.block_until_ready(out)

    # Reference in f32 from the same bf16 inputs (PyTorch layout: x @ W.T + b).
    ref = jnp.tanh(
        hidden_states[:, 0, :].astype(jnp.float32)
        @ weight.T.astype(jnp.float32)
        + bias.astype(jnp.float32)
    )
    assert out.shape == (B, H)
    assert jnp.allclose(out.astype(jnp.float32), ref, atol=2e-2, rtol=2e-2)

    print("KERNEL_OK")
</pallas_src>

<mosaic_0001>
module attributes {stable_mosaic.version = 11 : i64} {
  func.func @_pooler_kernel_fused(%arg0: i32, %arg1: i32, %arg2: memref<2x32xbf16, #tpu.memory_space<vmem>>, %arg3: memref<32x32xbf16, #tpu.memory_space<vmem>>, %arg4: memref<1x32xbf16, #tpu.memory_space<vmem>>, %arg5: memref<2x32xbf16, #tpu.memory_space<vmem>>) attributes {dimension_semantics = [#tpu.dimension_semantics<parallel>, #tpu.dimension_semantics<parallel>], iteration_bounds = array<i64: 1, 1>, scalar_prefetch = 0 : i64, scratch_operands = 0 : i64, tpu.core_type = #tpu.core_type<tc>, window_params = [{transform_indices = @transform_0, window_bounds = array<i64: 2, 32>}, {transform_indices = @transform_1, window_bounds = array<i64: 32, 32>}, {transform_indices = @transform_2, window_bounds = array<i64: 1, 32>}, {transform_indices = @transform_3, window_bounds = array<i64: 2, 32>}]} {
    %c0 = arith.constant 0 : index
    %c0_0 = arith.constant 0 : index
    %0 = vector.load %arg2[%c0, %c0_0] : memref<2x32xbf16, #tpu.memory_space<vmem>>, vector<2x32xbf16>
    %c0_1 = arith.constant 0 : index
    %c0_2 = arith.constant 0 : index
    %1 = vector.load %arg3[%c0_1, %c0_2] : memref<32x32xbf16, #tpu.memory_space<vmem>>, vector<32x32xbf16>
    %cst = arith.constant dense<0.000000e+00> : vector<2x32xf32>
    %2 = tpu.matmul %0, %1, %cst {dimension_numbers = #tpu.dot_dimension_numbers<[1], [0], [0], [1], [0, 0, 1, 1], [], []>} : vector<2x32xbf16>, vector<32x32xbf16>, vector<2x32xf32> -> vector<2x32xf32>
    %c0_3 = arith.constant 0 : index
    %c0_4 = arith.constant 0 : index
    %3 = vector.load %arg4[%c0_3, %c0_4] : memref<1x32xbf16, #tpu.memory_space<vmem>>, vector<1x32xbf16>
    %4 = arith.extf %3 : vector<1x32xbf16> to vector<1x32xf32>
    %5 = vector.broadcast %4 : vector<1x32xf32> to vector<2x32xf32>
    %6 = arith.addf %2, %5 : vector<2x32xf32>
    %7 = math.tanh %6 : vector<2x32xf32>
    %8 = arith.truncf %7 : vector<2x32xf32> to vector<2x32xbf16>
    %c0_5 = arith.constant 0 : index
    %c0_6 = arith.constant 0 : index
    %9 = vector.load %arg5[%c0_5, %c0_6] : memref<2x32xbf16, #tpu.memory_space<vmem>>, vector<2x32xbf16>
    tpu.vector_store %arg5[%c0_5, %c0_6], %8 {strides = array<i32>} : memref<2x32xbf16, #tpu.memory_space<vmem>>, vector<2x32xbf16>,
    return
  }
  func.func @transform_0(%arg0: i32, %arg1: i32) -> (i32, i32) {
    %c0_i32 = arith.constant 0 : i32
    %c0_i32_0 = arith.constant 0 : i32
    return %arg0, %c0_i32 : i32, i32
  }
  func.func @transform_1(%arg0: i32, %arg1: i32) -> (i32, i32) {
    %c0_i32 = arith.constant 0 : i32
    %c0_i32_0 = arith.constant 0 : i32
    return %c0_i32, %arg1 : i32, i32
  }
  func.func @transform_2(%arg0: i32, %arg1: i32) -> (i32, i32) {
    %c0_i32 = arith.constant 0 : i32
    %c0_i32_0 = arith.constant 0 : i32
    return %c0_i32, %arg1 : i32, i32
  }
  func.func @transform_3(%arg0: i32, %arg1: i32) -> (i32, i32) {
    %c0_i32 = arith.constant 0 : i32
    return %arg0, %arg1 : i32, i32
  }
}

</mosaic_0001>

<bundles_post_ra>
// kernel: tpu_custom_call.1
= control target key start
LH: loop header
LB: loop body
LE: loop exit
PB: predicated region body
PF: predicated region fallthrough
CT: control target
= control target key end

     0   :  { %8 = vsyncpa [#allocation3], 0  ;;  %s259_s0 = inlined_call_operand.hbm [shape: bf16[2,32], index: 0, kind: input, shape index: {}]   ;;  %s260_s1 = inlined_call_operand.hbm [shape: bf16[32,32], index: 1, kind: input, shape index: {}]   ;;  %s261_s2 = inlined_call_operand.vmem [shape: bf16[1,32], index: 2, kind: input, shape index: {}]   ;;  %s262_s3 = inlined_call_operand.hbm [shape: bf16[2,32], index: 3, kind: output, shape index: {}]  }
   0x1   :  { %9 = vsyncpa [#allocation6], 0 }
   0x2   :  { %10 = vsyncpa [#allocation4], 0  ;;  %s220_s12 = smov [#allocation2]   ;;  %s221_s14 = smov [#allocation5]  }
   0x3   :  { %s17_s13 = sshll.u32 %s220_s12, 4  ;;  %s26_s15 = sshll.u32 %s221_s14, 4  ;;  %s18_s13 = int_to_ptr.vmem [resolvable:$true] %s17_s13  ;;  %s27_s15 = int_to_ptr.vmem [resolvable:$true] %s26_s15 }
   0x4   :  { %s162_s16 = scalar_lea.vmem %s18_s13, 16  ;;  %s166_s17 = scalar_lea.vmem %s18_s13, 32 }
   0x5   :  { %p163_p0 = scmp.ne.s32.totalorder %s18_s13, %s162_s16  ;;  %p167_p1 = scmp.lt.s32.totalorder %s18_s13, %s18_s13 }
   0x6   :  { %p168_p2 = scmp.lt.s32.totalorder %s166_s17, %s162_s16 }
   0x8   :  { %p169_p3 = por %p168_p2, %p167_p1 }
   0xa   :  { %p170_p4 = pnand %p169_p3, %p163_p0 }
   0xc   :  { %173 = shalt.err (!%p170_p4)
}
   0xd   :  { %20 = dma.hbm_to_vmem [thread:$0]  %s259_s0, 16, %s18_s13, [#allocation3]  }
   0xe   :  { %s182_s20 = scalar_lea.vmem %s27_s15, 256  ;;  %p187_p6 = scmp.lt.s32.totalorder %s27_s15, %s27_s15 }
   0xf   :  { %p183_p5 = scmp.ne.s32.totalorder %s27_s15, %s182_s20  ;;  %p188_p7 = scmp.lt.s32.totalorder %s182_s20, %s182_s20 }
  0x11   :  { %p189_p8 = por %p188_p7, %p187_p6 }
  0x13   :  { %p190_p9 = pnand %p189_p8, %p183_p5 }
  0x15   :  { %193 = shalt.err (!%p190_p9)
}
  0x16   :  { %s222_s21 = smov 64   ;;  %s223_s22 = smov 4  }
  0x17   :  { %32 = dma.hbm_to_vmem [thread:$0]  %s260_s1, 256, %s27_s15, [#allocation6], %s222_s21, %s222_s21, %s223_s22  }
  0x18   :  { %214 = dma.done.wait [#allocation3], 16  }
  0x19   :  { %215 = vsyncadd [#allocation3], 4294967280 }
  0x1a   :  { %216 = dma.done.wait [#allocation6], 256  }
  0x1b   :  { %217 = vsyncadd [#allocation6], 4294967040  ;;  %v224_v0 = vmov 0.0   ;;  %vm225_vm0 = vmmov 0   ;;  %v150_v1 = vld [vmem:[#allocation5 + $0x8] sm:$0xff]   ;;  %v151_v2 = vld [vmem:[#allocation5] sm:$0xff]   ;;  %v49_v4 = vlaneseq }
  0x1c   :  { %135 = vmatprep.subr.bf16.mxu0 %v224_v0  ;;  %139 = vmatprep.mubr.msk.bf16.mxu0 %vm225_vm0, %v224_v0  ;;  %v42_v3 = vld [vmem:[#allocation2] sm:$0x1]  ;;  %vm65_vm1 = vcmask 261120   ;;  %s226_s25 = smov [#allocation7]   ;;  %vm111_vm2 = vcmask 253952  }
  0x1d   :  { %136 = vmatpush3.bf16.msra.mxu0 %v150_v1  ;;  %v50_v5 = vshrl.u32 %v49_v4, 7  ;;  %v47_v6 = vld [vmem:[%s261_s2] sm:$0x1]  ;;  %s119_s26 = sshll.u32 %s226_s25, 4  ;;  %s120_s26 = int_to_ptr.vmem [resolvable:$true] %s119_s26 }
  0x1e   :  { %137 = vmatprep.subr.bf16.mxu0 %v224_v0  ;;  %v48_v7 = vunpack.c.l.bf16 %v47_v6  ;;  %s194_s27 = scalar_lea.vmem %s120_s26, 16  ;;  %s198_s28 = scalar_lea.vmem %s120_s26, 32 }
  0x1f   :  { %v51_v8 = vsub.s32 0, %v50_v5  ;;  %p195_p10 = scmp.ne.s32.totalorder %s120_s26, %s194_s27  ;;  %p199_p11 = scmp.lt.s32.totalorder %s120_s26, %s120_s26 }
  0x20   :  { %p200_p12 = scmp.lt.s32.totalorder %s198_s28, %s194_s27 }
  0x21   :  { %138 = vmatpush3.bf16.msra.mxu0 %v151_v2  ;;  %v52_v9 = vrot.slane %v48_v7, %v51_v8 }
  0x22   :  { %p201_p13 = por %p200_p12, %p199_p11 }
  0x24   :  { %140 = vmatmul.mubr.msk.bf16.vlgmr.msra.gmra.mxu0 %vm65_vm1, %v42_v3  ;;  %p202_p0 = pnand %p201_p13, %p195_p10 }
  0xe4   :  { %v103_v10 = vpop.f32.mrf.mxu0 }
  0xe5   :  { %v104_v11 = vadd.f32 %v103_v10, %v52_v9 }
  0xe6   :  { %v141_v12 = vpop.f32.mrf.mxu0 }
  0xe7   :  { %152 = vtanh.f32 %v104_v11 }
  0xe8   :  { %v106_v13 = vpop.f32.mrf.mxu0 }
  0xea   :  { %v142_v14 = vpop.f32.mrf.mxu0 }
  0xf4   :  { %v153_v15 = vpop.eup %152 }
  0xf5   :  { %v110_v16 = vpack.c.bf16 %v153_v15, %v153_v15 }
  0xf7   :  { %112 = vst.msk [vmem:[#allocation7] sm:$0x1] %vm111_vm2, %v110_v16 }
  0xf8   :  { %205 = shalt.err (!%p202_p0)
}
  0xf9   :  { %122 = dma.vmem_to_hbm [thread:$0]  %s120_s26, 16, %s262_s3, [#allocation4]  }
  0xfa   :  { %218 = dma.done.wait [#allocation4], 16  }
  0xfb   :  { %219 = vsyncadd [#allocation4], 4294967280 }
  0xfc   :  { %126 = vsyncpa [#allocation3], 1 }
  0xfd   :  { %127 = vsyncpa [#allocation6], 1 }
  0xfe   :  { %128 = vsyncpa [#allocation4], 1 }

</bundles_post_ra>
